<compile_context>
chip_gen: v5e
topology: v5e:2x2
jax: 0.10.0
libtpu: 0.0.40
codegen_flags: <defaults>
</compile_context>

<pallas_src>
import math

import jax
import jax.numpy as jnp
from jax import lax
from jax.experimental import pallas as pl
from jax.experimental.pallas import tpu as pltpu

_MXU_DTYPE = jnp.bfloat16      # MXU operand dtype; accumulation is always f32


def _round_up(x, m):
    return ((x + m - 1) // m) * m


# ----------------------------------------------------------------------------
# Row/column-tiled linear:  o = x @ w + b   (w stored transposed, bf16)
# ----------------------------------------------------------------------------
def _linear_kernel(x_ref, w_ref, b_ref, o_ref):
    x = x_ref[...].astype(_MXU_DTYPE)
    acc = jnp.dot(x, w_ref[...], preferred_element_type=jnp.float32)
    o_ref[...] = (acc + b_ref[...]).astype(o_ref.dtype)


def linear(x2d, w, b, *, row_tile=256, col_tile=256, out_dtype=_MXU_DTYPE):
    """x2d: (N, d_in); w: (d_in, d_out) bf16 (torch weight transposed); b: (d_out,) f32."""
    N, d_in = x2d.shape
    d_out = w.shape[1]

    # Row tiling: pad N up to the tile instead of making the block the whole array.
    tm = min(row_tile, _round_up(N, 8))
    Np = _round_up(N, tm)
    if Np != N:
        x2d = jnp.pad(x2d, ((0, Np - N), (0, 0)))

    # Column tiling bounds VMEM independent of d_model.
    if d_out % col_tile == 0:
        tn = col_tile
    elif d_out % 128 == 0:
        tn = 128
    else:
        tn = d_out

    out = pl.pallas_call(
        _linear_kernel,
        out_shape=jax.ShapeDtypeStruct((Np, d_out), out_dtype),
        grid=(Np // tm, d_out // tn),
        in_specs=[
            pl.BlockSpec((tm, d_in), lambda i, j: (i, 0)),
            pl.BlockSpec((d_in, tn), lambda i, j: (0, j)),   # weight column strip
            pl.BlockSpec((1, tn), lambda i, j: (0, j)),
        ],
        out_specs=pl.BlockSpec((tm, tn), lambda i, j: (i, j)),
        compiler_params=pltpu.CompilerParams(
            dimension_semantics=("parallel", "parallel"),
            vmem_limit_bytes=64 * 1024 * 1024),
    )(x2d, w.astype(_MXU_DTYPE), b.reshape(1, d_out).astype(jnp.float32))
    return out[:N] if Np != N else out


# ----------------------------------------------------------------------------
# Flash-style multi-head attention kernel (online softmax over K tiles)
# ----------------------------------------------------------------------------
def _make_flash_kernel(*, has_mask, num_heads, dk, tq, tk, sk, causal):
    def kernel(*refs):
        if has_mask:
            q_ref, k_ref, v_ref, mask_ref, o_ref, m_ref, l_ref, acc_ref = refs
        else:
            q_ref, k_ref, v_ref, o_ref, m_ref, l_ref, acc_ref = refs
            mask_ref = None

        qi = pl.program_id(1)
        ki = pl.program_id(2)
        nk = pl.num_programs(2)

        @pl.when(ki == 0)
        def _init():
            m_ref[...] = jnp.full(m_ref.shape, -jnp.inf, dtype=jnp.float32)
            l_ref[...] = jnp.zeros(l_ref.shape, dtype=jnp.float32)
            acc_ref[...] = jnp.zeros(acc_ref.shape, dtype=jnp.float32)

        def _compute():
            # (tq, tk) "masked out" map generated in registers (no HBM mask needed
            # for key padding / causal).
            col = ki * tk + lax.broadcasted_iota(jnp.int32, (tq, tk), 1)
            neg = col >= sk                                   # padded key columns
            if causal:
                row = qi * tq + lax.broadcasted_iota(jnp.int32, (tq, tk), 0)
                neg = jnp.logical_or(neg, row < col)
            if has_mask:
                neg = jnp.logical_or(neg, mask_ref[0] == 0)   # torch masked_fill(mask==0)

            q = q_ref[0]                                      # (tq, d_model) bf16, pre-scaled
            k = k_ref[0]
            v = v_ref[0]

            for h in range(num_heads):                        # static unroll over heads
                sl = slice(h * dk, (h + 1) * dk)
                # scores: contract d_k on the last axis of both operands (no K transpose)
                s = lax.dot_general(q[:, sl], k[:, sl],
                                    (((1,), (1,)), ((), ())),
                                    preferred_element_type=jnp.float32)   # (tq, tk)
                s = jnp.where(neg, jnp.float32(-1e9), s)

                m_prev = m_ref[h]                             # (tq, 1)
                m_new = jnp.maximum(m_prev, jnp.max(s, axis=-1, keepdims=True))
                alpha = jnp.exp(m_prev - m_new)
                p = jnp.exp(s - m_new)
                l_ref[h] = alpha * l_ref[h] + jnp.sum(p, axis=-1, keepdims=True)
                acc_ref[:, sl] = alpha * acc_ref[:, sl] + lax.dot_general(
                    p.astype(v.dtype), v[:, sl],
                    (((1,), (0,)), ((), ())),
                    preferred_element_type=jnp.float32)
                m_ref[h] = m_new

        if causal:
            # Skip K tiles that are entirely above the diagonal for this Q tile.
            pl.when(ki * tk <= qi * tq + (tq - 1))(_compute)
        else:
            _compute()

        @pl.when(ki == nk - 1)
        def _finalize():
            for h in range(num_heads):
                sl = slice(h * dk, (h + 1) * dk)
                acc_ref[:, sl] = acc_ref[:, sl] * pl.reciprocal(l_ref[h], approx=True)
            o_ref[0] = acc_ref[...].astype(o_ref.dtype)       # one lane-dense store

    return kernel


def _normalize_mask(mask, Sq, Sk, Sq_p, Sk_p):
    """Torch-style broadcastable mask -> (Bm, mq_p, Sk_p) int8 (0 = masked)."""
    m = mask
    if m.ndim == 4:
        if m.shape[1] != 1:
            # TODO(synk): genuinely per-head masks (B, H>1, Sq, Sk) are not supported.
            raise NotImplementedError("per-head attention masks are not supported")
        m = m[:, 0]
    elif m.ndim == 2:
        m = m[None]
    m = (m != 0).astype(jnp.int8)
    mq = m.shape[1]
    if mq not in (1, Sq):
        raise ValueError(f"mask query dim must be 1 or {Sq}, got {mq}")
    mq_p = 1 if mq == 1 else Sq_p
    m = jnp.pad(m, ((0, 0), (0, mq_p - mq), (0, Sk_p - Sk)))   # padded keys -> masked
    return m, mq_p


def _flash_mha(q_arr, k_arr, v_arr, mask, *, num_heads, d_model,
               q_off, k_off, v_off, causal, q_tile=256, k_tile=256):
    """q/k/v_arr: (B, S, n*d_model) packed activations (bf16); *_off picks the
    d_model-wide column group via the BlockSpec index_map (no XLA slicing)."""
    B, Sq = q_arr.shape[0], q_arr.shape[1]
    Sk = k_arr.shape[1]
    dk = d_model // num_heads

    tq = min(q_tile, _round_up(Sq, 8))
    tk = min(k_tile, _round_up(Sk, 8))
    Sq_p = _round_up(Sq, tq)
    Sk_p = _round_up(Sk, tk)

    def pad_seq(a, s, sp):
        return a if sp == s else jnp.pad(a, ((0, 0), (0, sp - s), (0, 0)))

    if (q_arr is k_arr) and (k_arr is v_arr) and Sq_p == Sk_p:
        q_arr = k_arr = v_arr = pad_seq(q_arr, Sq, Sq_p)       # packed self-attention
    else:
        q_arr = pad_seq(q_arr, Sq, Sq_p)
        k_arr = pad_seq(k_arr, Sk, Sk_p)
        v_arr = pad_seq(v_arr, Sk, Sk_p)

    has_mask = (mask is not None) and (not causal)

    grid = (B, Sq_p // tq, Sk_p // tk)
    q_spec = pl.BlockSpec((1, tq, d_model), lambda b, qi, ki: (b, qi, q_off))
    k_spec = pl.BlockSpec((1, tk, d_model), lambda b, qi, ki: (b, ki, k_off))
    v_spec = pl.BlockSpec((1, tk, d_model), lambda b, qi, ki: (b, ki, v_off))
    out_spec = pl.BlockSpec((1, tq, d_model), lambda b, qi, ki: (b, qi, 0))

    in_specs = [q_spec, k_spec, v_spec]
    operands = [q_arr, k_arr, v_arr]
    if has_mask:
        m_arr, mq_p = _normalize_mask(mask, Sq, Sk, Sq_p, Sk_p)
        Bm = m_arr.shape[0]
        bsel = (lambda b: b) if Bm > 1 else (lambda b: 0)      # batch-invariant if possible
        if mq_p == 1:
            m_spec = pl.BlockSpec((1, 1, tk), lambda b, qi, ki: (bsel(b), 0, ki))
        else:
            m_spec = pl.BlockSpec((1, tq, tk), lambda b, qi, ki: (bsel(b), qi, ki))
        in_specs.append(m_spec)
        operands.append(m_arr)

    kern = _make_flash_kernel(has_mask=has_mask, num_heads=num_heads, dk=dk,
                              tq=tq, tk=tk, sk=Sk, causal=causal)

    out = pl.pallas_call(
        kern,
        out_shape=jax.ShapeDtypeStruct((B, Sq_p, d_model), _MXU_DTYPE),
        grid=grid,
        in_specs=in_specs,
        out_specs=out_spec,
        scratch_shapes=[
            pltpu.VMEM((num_heads, tq, 1), jnp.float32),   # running max
            pltpu.VMEM((num_heads, tq, 1), jnp.float32),   # running denominator
            pltpu.VMEM((tq, d_model), jnp.float32),        # lane-dense accumulator
        ],
        compiler_params=pltpu.CompilerParams(
            dimension_semantics=("parallel", "parallel", "arbitrary"),
            vmem_limit_bytes=64 * 1024 * 1024),
    )(*operands)
    return out[:, :Sq] if Sq_p != Sq else out


# ----------------------------------------------------------------------------
# Module-level wrapper (mirrors nn.MultiHeadAttention.forward)
# ----------------------------------------------------------------------------
def init_mha_params(key, d_model, num_heads):
    """nn.Linear-style init; Wq|Wk|Wv stored fused & transposed, bf16-resident,
    with 1/sqrt(d_k) pre-folded into the Q column group (kernel never rescales)."""
    k1, k2, k3, k4 = jax.random.split(key, 4)
    bound = 1.0 / math.sqrt(d_model)
    dk = d_model // num_heads
    scale = 1.0 / math.sqrt(dk)
    w_in = jax.random.uniform(k1, (d_model, 3 * d_model), jnp.float32, -bound, bound)
    b_in = jax.random.uniform(k2, (3 * d_model,), jnp.float32, -bound, bound)
    w_in = w_in.at[:, :d_model].multiply(scale)
    b_in = b_in.at[:d_model].multiply(scale)
    w_o = jax.random.uniform(k3, (d_model, d_model), jnp.float32, -bound, bound)
    b_o = jax.random.uniform(k4, (d_model,), jnp.float32, -bound, bound)
    return {
        "w_in": w_in.astype(_MXU_DTYPE),   # bf16-resident weights
        "b_in": b_in,                      # biases stay f32
        "w_o": w_o.astype(_MXU_DTYPE),
        "b_o": b_o,
    }


def multi_head_attention(params, Q, K, V, mask=None, *, num_heads, causal=False):
    B, Sq, d_model = Q.shape
    Sk = K.shape[1]
    assert d_model % num_heads == 0

    if (Q is K) and (K is V):
        # Self-attention: one fused QKV matmul; the attention kernel picks the
        # q/k/v column groups straight from the packed bf16 output via index_map.
        qkv = linear(Q.reshape(B * Sq, d_model), params["w_in"], params["b_in"])
        q_arr = k_arr = v_arr = qkv.reshape(B, Sq, 3 * d_model)
        q_off, k_off, v_off = 0, 1, 2
    else:
        D = d_model
        q_arr = linear(Q.reshape(B * Sq, D), params["w_in"][:, :D],
                       params["b_in"][:D]).reshape(B, Sq, D)
        k_arr = linear(K.reshape(B * Sk, D), params["w_in"][:, D:2 * D],
                       params["b_in"][D:2 * D]).reshape(B, Sk, D)
        v_arr = linear(V.reshape(B * Sk, D), params["w_in"][:, 2 * D:],
                       params["b_in"][2 * D:]).reshape(B, Sk, D)
        q_off = k_off = v_off = 0

    # Packed-column indexing needs d_model % 128 == 0; otherwise fall back to
    # explicit slices so every BlockSpec last dim equals the full array dim.
    if d_model % 128 != 0:
        def _unpack(arr, off):
            if arr.shape[-1] == d_model:
                return arr, 0
            return lax.slice_in_dim(arr, off * d_model, (off + 1) * d_model, axis=-1), 0
        q_arr, q_off = _unpack(q_arr, q_off)
        k_arr, k_off = _unpack(k_arr, k_off)
        v_arr, v_off = _unpack(v_arr, v_off)

    attn = _flash_mha(q_arr, k_arr, v_arr, mask, num_heads=num_heads,
                      d_model=d_model, q_off=q_off, k_off=k_off, v_off=v_off,
                      causal=causal)

    out = linear(attn.reshape(B * Sq, d_model), params["w_o"], params["b_o"],
                 out_dtype=jnp.float32)        # module output stays f32
    return out.reshape(B, Sq, d_model)


# ----------------------------------------------------------------------------
if __name__ == "__main__":
    d_model, num_heads = 128, 4
    B, S = 2, 8

    key = jax.random.PRNGKey(0)
    kp, kx = jax.random.split(key)
    params = init_mha_params(kp, d_model, num_heads)
    x = jax.random.normal(kx, (B, S, d_model), jnp.float32)

    # torch-style causal mask in the (B, 1, S, S) layout (explicit-mask path)
    mask = jnp.broadcast_to(jnp.tril(jnp.ones((S, S), jnp.int32))[None, None],
                            (B, 1, S, S))

    out_masked = multi_head_attention(params, x, x, x, mask, num_heads=num_heads)
    # same computation via the in-kernel causal mask + K-tile skipping path
    out_causal = multi_head_attention(params, x, x, x, None, num_heads=num_heads,
                                      causal=True)
    jax.block_until_ready((out_masked, out_causal))

    assert out_masked.shape == (B, S, d_model)
    assert bool(jnp.all(jnp.isfinite(out_masked)))
    assert bool(jnp.allclose(out_masked, out_causal, atol=1e-3, rtol=1e-3))
    print("KERNEL_OK")
</pallas_src>

<mosaic_0001>
module attributes {stable_mosaic.version = 11 : i64} {
  func.func @_linear_kernel(%arg0: i32, %arg1: i32, %arg2: memref<16x128xf32, #tpu.memory_space<vmem>>, %arg3: memref<128x128xbf16, #tpu.memory_space<vmem>>, %arg4: memref<1x128xf32, #tpu.memory_space<vmem>>, %arg5: memref<16x128xbf16, #tpu.memory_space<vmem>>) attributes {dimension_semantics = [#tpu.dimension_semantics<parallel>, #tpu.dimension_semantics<parallel>], iteration_bounds = array<i64: 1, 3>, scalar_prefetch = 0 : i64, scratch_operands = 0 : i64, tpu.core_type = #tpu.core_type<tc>, window_params = [{transform_indices = @transform_0, window_bounds = array<i64: 16, 128>}, {transform_indices = @transform_1, window_bounds = array<i64: 128, 128>}, {transform_indices = @transform_2, window_bounds = array<i64: 1, 128>}, {transform_indices = @transform_3, window_bounds = array<i64: 16, 128>}]} {
    %c0 = arith.constant 0 : index
    %c0_0 = arith.constant 0 : index
    %0 = vector.load %arg2[%c0, %c0_0] : memref<16x128xf32, #tpu.memory_space<vmem>>, vector<16x128xf32>
    %1 = arith.truncf %0 : vector<16x128xf32> to vector<16x128xbf16>
    %c0_1 = arith.constant 0 : index
    %c0_2 = arith.constant 0 : index
    %2 = vector.load %arg3[%c0_1, %c0_2] : memref<128x128xbf16, #tpu.memory_space<vmem>>, vector<128x128xbf16>
    %cst = arith.constant dense<0.000000e+00> : vector<16x128xf32>
    %3 = tpu.matmul %1, %2, %cst {dimension_numbers = #tpu.dot_dimension_numbers<[1], [0], [0], [1], [0, 0, 1, 1], [], []>} : vector<16x128xbf16>, vector<128x128xbf16>, vector<16x128xf32> -> vector<16x128xf32>
    %c0_3 = arith.constant 0 : index
    %c0_4 = arith.constant 0 : index
    %4 = vector.load %arg4[%c0_3, %c0_4] : memref<1x128xf32, #tpu.memory_space<vmem>>, vector<1x128xf32>
    %5 = vector.broadcast %4 : vector<1x128xf32> to vector<16x128xf32>
    %6 = arith.addf %3, %5 : vector<16x128xf32>
    %7 = arith.truncf %6 : vector<16x128xf32> to vector<16x128xbf16>
    %c0_5 = arith.constant 0 : index
    %c0_6 = arith.constant 0 : index
    %8 = vector.load %arg5[%c0_5, %c0_6] : memref<16x128xbf16, #tpu.memory_space<vmem>>, vector<16x128xbf16>
    tpu.vector_store %arg5[%c0_5, %c0_6], %7 {strides = array<i32>} : memref<16x128xbf16, #tpu.memory_space<vmem>>, vector<16x128xbf16>,
    return
  }
  func.func @transform_0(%arg0: i32, %arg1: i32) -> (i32, i32) {
    %c0_i32 = arith.constant 0 : i32
    %c0_i32_0 = arith.constant 0 : i32
    return %arg0, %c0_i32 : i32, i32
  }
  func.func @transform_1(%arg0: i32, %arg1: i32) -> (i32, i32) {
    %c0_i32 = arith.constant 0 : i32
    %c0_i32_0 = arith.constant 0 : i32
    return %c0_i32, %arg1 : i32, i32
  }
  func.func @transform_2(%arg0: i32, %arg1: i32) -> (i32, i32) {
    %c0_i32 = arith.constant 0 : i32
    %c0_i32_0 = arith.constant 0 : i32
    return %c0_i32, %arg1 : i32, i32
  }
  func.func @transform_3(%arg0: i32, %arg1: i32) -> (i32, i32) {
    %c0_i32 = arith.constant 0 : i32
    return %arg0, %arg1 : i32, i32
  }
}

</mosaic_0001>

<bundles_post_ra>
// kernel: tpu_custom_call.1
= control target key start
LH: loop header
LB: loop body
LE: loop exit
PB: predicated region body
PF: predicated region fallthrough
CT: control target
= control target key end

     0   :  { %8 = vsyncpa [#allocation3], 0  ;;  %s1009_s0 = inlined_call_operand.hbm [shape: f32[16,128], index: 0, kind: input, shape index: {}]   ;;  %s1010_s1 = inlined_call_operand.hbm [shape: bf16[128,384], index: 1, kind: input, shape index: {}]   ;;  %s1011_s2 = inlined_call_operand.hbm [shape: f32[1,384], index: 2, kind: input, shape index: {}]   ;;  %s1012_s3 = inlined_call_operand.hbm [shape: bf16[16,384], index: 3, kind: output, shape index: {}]  }
   0x1   :  { %9 = vsyncpa [#allocation6], 0 }
   0x2   :  { %11 = vsyncpa [#allocation6 + $0x1], 0 }
   0x3   :  { %12 = vsyncpa [#allocation4], 0 }
   0x4   :  { %14 = vsyncpa [#allocation4 + $0x1], 0  ;;  %s837_s12 = smov 0   ;;  %s839_s13 = smov 0  }
   0x5   :  { %s841_s14 = smov 0   ;;  %s843_s15 = smov 0  }
   0x6   :  { %s845_s16 = smov 0   ;;  %s847_s17 = smov 0  }
   0x7 LB: > { %s29_s18 = sadd.s32 1, %s802_s16  ;;  %s65_s19 = sadd.s32 1, %s794_s14  ;;  %s806_s17 = sphi %s847_s17, %s20_s17   ;;  %s802_s16 = sphi %s845_s16, %s1023_s16   ;;  %s798_s15 = sphi %s843_s15, %s1022_s15   ;;  %s794_s14 = sphi %s841_s14, %s1021_s14   ;;  %s790_s13 = sphi %s839_s13, %s1020_s13   ;;  %s786_s12 = sphi %s837_s12, %s1019_s12  }
   0x8   : > { %p30_p0 = scmp.ge.s32.totalorder %s29_s18, 3  ;;  %p72_p1 = scmp.ne.s32.totalorder %s794_s14, %s790_s13 }
   0x9   : > { %p73_p2 = scmp.eq.s32.totalorder %s806_s17, 0  ;;  %p569_p4 = scmp.lt.s32.totalorder %s806_s17, 3 }
   0xa   : > { %s1025_s18 = smov (%p30_p0, %s29_s18), 0  ;;  %s173_s22 = sand.u32 1, %s806_s17  }
   0xb   : > { %p877_p3 = por %p73_p2, %p72_p1  ;;  %s62_s21 = ssub.s32 %s802_s16, %s1025_s18 }
   0xc   : > { %p63_p5 = scmp.eq.s32.totalorder %s62_s21, 0  ;;  %s175_s23 = sand.u32 1, %s794_s14  }
   0xd   : > { %s489_s24 = sshll.u32 %s802_s16, 2  ;;  %s488_s26 = sshll.u32 %s175_s23, 6 }
   0xe   : > { %s888_s25 = scalar_select %p63_p5, %s794_s14, %s65_s19  }
   0xf   : > { %s181_s29 = scalar_lea.hbm %s1010_s1, %s489_s24  ;;  %s177_s4 = scalar_lea.vmem [#allocation5], %s488_s26 }
  0x10   : > { %s182_s30 = sshll.u32 %s181_s29, 4  ;;  %s184_s5 = sshll.u32 %s177_s4, 4  ;;  %s183_s30 = int_to_ptr.hbm [resolvable:$true] %s182_s30  ;;  %s185_s5 = int_to_ptr.vmem [resolvable:$true] %s184_s5 }
  0x11   : > { %p899_p6 = pnand %p569_p4, %p877_p3  ;;  %s903_s7 = scalar_lea.sflag [#allocation6], %s173_s22 }
  0x12   : > { %s808_s8 = smov 192   ;;  %s809_s9 = smov 64  }
  0x13   : > { %s810_s10 = smov 4   ;;  %s909_s11 = sadd.s32 4294967295, %s806_s17  }
  0x14   : > { %560 = dma.hbm_to_vmem [thread:$0]  (!%p899_p6), %s183_s30, 1024, %s185_s5, %s903_s7, %s808_s8, %s809_s9, %s810_s10  }
  0x15   : > { %s484_s19 = sadd.s32 4294967294, %s806_s17   ;;  %p78_p7 = scmp.ne.s32.totalorder %s790_s13, %s786_s12 }
  0x16   : > { %p79_p8 = scmp.eq.s32.totalorder %s909_s11, 0  ;;  %p130_p9 = scmp.eq.s32.totalorder %s909_s11, 2 }
  0x17   : > { %p136_p10 = scmp.eq.s32.totalorder %s484_s19, 2  ;;  %p485_p12 = scmp.ge.s32.totalorder %s806_s17, 1 }
  0x18   : > { %p918_p11 = por %p79_p8, %p78_p7  ;;  %p926_p13 = por %p130_p9, %p72_p1 }
  0x19   : > { %p930_p0 = por %p136_p10, %p78_p7  ;;  %p143_p2 = scmp.lt.s32.totalorder %s806_s17, 4 }
  0x1a   : > { %s157_s27 = sshll.u32 %s1009_s0, 4  ;;  %s811_s29 = smov [#allocation2]   ;;  %s158_s27 = int_to_ptr.hbm [resolvable:$true] %s157_s27 }
  0x1b   : > { %p938_p3 = pnand %p485_p12, %p143_p2  ;;  %s159_s30 = sshll.u32 %s811_s29, 4  ;;  %s160_s30 = int_to_ptr.vmem [resolvable:$true] %s159_s30 }
  0x1c   : > { %s200_s8 = scalar_lea.hbm %s1011_s2, %s802_s16  ;;  %s197_s10 = scalar_lea.vmem [#allocation7], %s175_s23 }
  0x1d   : > { %p553_p1 = pneg %p938_p3  ;;  %s202_s9 = sshll.u32 %s200_s8, 4  ;;  %s203_s9 = int_to_ptr.hbm [resolvable:$true] %s202_s9 }
  0x1e   : > { %s204_s19 = sshll.u32 %s197_s10, 4  ;;  %s812_s24 = smov 128   ;;  %s205_s19 = int_to_ptr.vmem [resolvable:$true] %s204_s19 }
  0x1f   : > { %p554_p4 = pnand %p553_p1, %p79_p8  ;;  %s813_s26 = smov 8  }
  0x20   : > { %563 = dma.hbm_to_vmem [thread:$0]  (!%p899_p6), %s203_s9, 16, %s205_s19, %s903_s7  }
  0x21   : > { %556 = dma.hbm_to_vmem [thread:$0]  (!%p554_p4), %s158_s27, 256, %s160_s30, [#allocation3], %s812_s24, %s812_s24, %s813_s26  }
  0x22   : > { %213 = sbr.rel (%p938_p3) target bundleno = 219 (0xdb), region = 32 }
  0x27   : > { %773 = dma.done.wait (%p79_p8), [#allocation3], 256  }
  0x28   : > { %775 = vsyncadd (%p79_p8), [#allocation3], 4294967040  ;;  %s220_s23 = sand.u32 1, %s909_s11   ;;  %s963_s29 = sand.u32 1, %s790_s13  }
  0x29   : > { %s492_s27 = sshll.u32 %s963_s29, 6  ;;  %s221_s30 = scalar_lea.sflag [#allocation6], %s220_s23 }
  0x2a   : > { %s224_s6 = scalar_lea.vmem [#allocation5], %s492_s27 }
  0x2b   : > { %777 = dma.done.wait (%p918_p11), %s221_s30, 1040  }
  0x2c   : > { %779 = vsyncadd (%p918_p11), %s221_s30, 4294966256  ;;  %v537_v0 = vld [vmem:[%s224_s6 + $0x38] sm:$0xff]  ;;  %v536_v1 = vld [vmem:[%s224_s6 + $0x30] sm:$0xff]  ;;  %s233_s7 = scalar_lea.vmem [#allocation7], %s963_s29  ;;  %s493_s11 = sshll.u32 %s963_s29, 3 }
  0x2d   : > { %334 = vmatpush.bf16.msra.mxu0 %v537_v0  ;;  %v535_v2 = vld [vmem:[%s224_s6 + $0x28] sm:$0xff]  ;;  %v534_v3 = vld [vmem:[%s224_s6 + $0x20] sm:$0xff]  ;;  %v533_v4 = vld [vmem:[%s224_s6 + $0x18] sm:$0xff]  ;;  %s527_s20 = sshll.u32 %s798_s15, 2  ;;  %s260_s8 = scalar_lea.vmem [#allocation8], %s493_s11 }
  0x2e   : > { %v532_v5 = vld [vmem:[%s224_s6 + $0x10] sm:$0xff]  ;;  %v531_v6 = vld [vmem:[%s224_s6 + $0x8] sm:$0xff]  ;;  %v530_v7 = vld [vmem:[%s224_s6] sm:$0xff]  ;;  %s366_s5 = scalar_lea.hbm %s1012_s3, %s527_s20  ;;  %s367_s9 = sshll.u32 %s260_s8, 4  ;;  %s368_s9 = int_to_ptr.vmem [resolvable:$true] %s367_s9 }
  0x2f   : > { %v263_v8 = vld [vmem:[#allocation2] sm:$0xff]  ;;  %v264_v9 = vld [vmem:[#allocation2 + $0x8] sm:$0xff]  ;;  %s369_s10 = sshll.u32 %s366_s5, 4  ;;  %s353_s19 = scalar_lea.sflag [#allocation4], %s963_s29  ;;  %s370_s10 = int_to_ptr.hbm [resolvable:$true] %s369_s10 }
  0x30   : > { %v265_v10 = vpack.c.bf16 %v264_v9, %v263_v8  ;;  %v629_v12 = vld [vmem:[%s233_s7] ss:$0 sm:$0xff]  ;;  %s734_s24 = sshra.s32 %s370_s10, 4  ;;  %s740_s27 = scalar_lea.hbm %s1012_s3, 24  ;;  %s735_s24 = int_to_ptr.hbm [resolvable:$true] %s734_s24 }
  0x31   : > { %335 = vmatpush.bf16.msra.mxu0 %v536_v1  ;;  %s736_s15 = scalar_lea.hbm %s735_s24, 8  ;;  %p741_p8 = scmp.lt.s32.totalorder %s735_s24, %s1012_s3 }
  0x32   : > { %p737_p5 = scmp.ne.s32.totalorder %s735_s24, %s736_s15  ;;  %p742_p9 = scmp.lt.s32.totalorder %s740_s27, %s736_s15 }
  0x34   : > { %p738_p6 = pnand %p737_p5, %p926_p13  ;;  %p743_p10 = por %p742_p9, %p741_p8 }
  0x35   : > { %336 = vmatpush.bf16.msra.mxu0 %v535_v2 }
  0x36   : > { %p739_p7 = pneg %p738_p6 }
  0x38   : > { %p744_p11 = pnand %p743_p10, %p739_p7 }
  0x39   : > { %337 = vmatpush.bf16.msra.mxu0 %v534_v3 }
  0x3d   : > { %338 = vmatpush.bf16.msra.mxu0 %v533_v4 }
  0x41   : > { %339 = vmatpush.bf16.msra.mxu0 %v532_v5 }
  0x45   : > { %340 = vmatpush.bf16.msra.mxu0 %v531_v6 }
  0x49   : > { %341 = vmatpush.bf16.msra.mxu0 %v530_v7 }
  0x4c   : > { %342 = vmatmul.bf16.vlgmr.msra.gmra.mxu0 %v265_v10 }
  0xc9   : > { %v343_v11 = vpop.f32.mrf.mxu0 }
  0xca   : > { %v344_v14 = vadd.f32 %v629_v12, %v343_v11 }
  0xd1   : > { %v345_v13 = vpop.f32.mrf.mxu0 }
  0xd2   : > { %v346_v15 = vadd.f32 %v629_v12, %v345_v13 }
  0xd4   : > { %v541_v16 = vpack.c.bf16 %v346_v15, %v344_v14 }
  0xd6   : > { %542 = vst [vmem:[%s260_s8] sm:$0xff] %v541_v16  }
  0xd7   : > { %747 = shalt.err (!%p744_p11)
}
  0xd8   : > { %s814_s29 = smov 64   ;;  %s815_s7 = smov 192  }
  0xd9   : > { %s816_s11 = smov 4  }
  0xda   : > { %551 = dma.vmem_to_hbm [thread:$0]  (%p926_p13), %s368_s9, 128, %s370_s10, %s353_s19, %s814_s29, %s815_s7, %s816_s11  }
  0xdb PF: > { %p571_p12 = scmp.ge.s32.totalorder %s806_s17, 2  ;;  %s384_s20 = sand.u32 1, %s786_s12  }
  0xdc   : > { %s385_s28 = scalar_lea.sflag [#allocation4], %s384_s20 }
  0xdd   : > { %p565_p2 = pnand %p571_p12, %p930_p0 }
  0xdf   : > { %p566_p3 = pneg %p565_p2 }
  0xe1   : > { %781 = dma.done.wait (%p566_p3), %s385_s28, 128  }
  0xe2   : > { %783 = vsyncadd (%p566_p3), %s385_s28, 4294967168  ;;  %s20_s17 = sadd.s32 1, %s806_s17   ;;  %s1019_s12 = smov %s790_s13 }
  0xe3   : > { %p17_p1 = scmp.ge.s32.totalorder %s20_s17, 5   ;;  %s1020_s13 = smov %s794_s14 }
  0xe4   : > { %s1021_s14 = smov %s888_s25  ;;  %s1022_s15 = smov %s802_s16 }
  0xe5   : > { %s1023_s16 = smov %s1025_s18  ;;  %19 = sbr.rel (!%p17_p1) target bundleno = 7 (0x7), region = 94 }
  0xea   :  { %391 = vsyncpa [#allocation3], 1 }
  0xeb   :  { %393 = vsyncpa [#allocation3 + $0x1], 1 }
  0xec   :  { %394 = vsyncpa [#allocation6], 1 }
  0xed   :  { %396 = vsyncpa [#allocation6 + $0x1], 1 }
  0xee   :  { %397 = vsyncpa [#allocation4], 1 }
  0xef   :  { %399 = vsyncpa [#allocation4 + $0x1], 1 }

</bundles_post_ra>
